<compile_context>
chip_gen: v5e
topology: v5e:2x2
jax: 0.10.0
libtpu: 0.0.40
codegen_flags: <defaults>
</compile_context>

<pallas_src>
import functools

import jax
import jax.numpy as jnp
from jax.experimental import pallas as pl
from jax.experimental.pallas import tpu as pltpu


def _detect_num_tensorcores():
    """Best-effort TensorCores-per-chip (2 on v7x, 1 on v5e/v6e).

    Falls back to 1 if the runtime does not expose a core count, which is
    always safe (just leaves the second v7x core idle)."""
    try:
        info = pltpu.get_tpu_info()
        for attr in ("num_cores", "core_count", "num_tensorcores",
                     "tensorcores_per_chip", "cores_per_chip"):
            v = getattr(info, attr, None)
            if isinstance(v, int) and v >= 1:
                return v
    except Exception:
        pass
    return 1


def _partial_sums_kernel(p_ref, t_ref, acc_ref, *, rows_per_tile, sub_rows,
                         n_sub, lanes, tiles_per_core, total_rows, need_mask,
                         unroll):
    c = pl.program_id(0)
    i = pl.program_id(1)

    @pl.when(i == 0)
    def _init():
        acc_ref[...] = jnp.zeros_like(acc_ref)

    # First global row covered by this grid step.  Row-based (not flat-element
    # based) indexing keeps this in int32 up to 2**31 rows (~2.7e11 elements).
    tile_row0 = (c * tiles_per_core + i) * rows_per_tile

    def accumulate(masked):
        def body(j, carry):
            bce_acc, int_acc, tot_acc = carry
            r0 = pl.multiple_of(j * sub_rows, sub_rows)
            # Native-width VMEM -> vreg loads; all math in f32.
            p = p_ref[pl.ds(r0, sub_rows), :].astype(jnp.float32)
            t = t_ref[pl.ds(r0, sub_rows), :].astype(jnp.float32)
            if masked:
                # Zero garbage rows of a partial / overflow block *before* the
                # clip/log so stale NaNs cannot leak into the sums.
                row = jax.lax.broadcasted_iota(jnp.int32, (sub_rows, lanes), 0)
                valid = (tile_row0 + r0 + row) < total_rows
                p = jnp.where(valid, p, 0.0)
                t = jnp.where(valid, t, 0.0)
            p = jnp.clip(p, 0.0, 1.0)
            t = jnp.clip(t, 0.0, 1.0)
            log_p = jnp.maximum(jnp.log(p), -100.0)
            log_1mp = jnp.maximum(jnp.log(1.0 - p), -100.0)
            # -(t*log(p) + (1-t)*log(1-p)) rewritten to drop one mul and the
            # (1-t) temporary.  p=t=0 (padding / masked) contributes exactly 0.
            bce = -(t * (log_p - log_1mp) + log_1mp)
            inter = p * t
            tot = p + t
            # Reduce (sub_rows, 128) -> (8, 128): pure VPU vreg adds.
            shape3 = (sub_rows // 8, 8, lanes)
            bce_acc = bce_acc + bce.reshape(shape3).sum(axis=0)
            int_acc = int_acc + inter.reshape(shape3).sum(axis=0)
            tot_acc = tot_acc + tot.reshape(shape3).sum(axis=0)
            return bce_acc, int_acc, tot_acc

        zero = jnp.zeros((8, lanes), jnp.float32)
        bce_s, int_s, tot_s = jax.lax.fori_loop(
            0, n_sub, body, (zero, zero, zero), unroll=unroll)
        acc_ref[0, 0, :, :] += bce_s
        acc_ref[0, 1, :, :] += int_s
        acc_ref[0, 2, :, :] += tot_s

    if need_mask:
        # Only the ragged last tile (or an overflow re-fetch tile when tiles
        # do not split evenly across cores) pays for masking; interior tiles
        # take the unmasked fast path.
        tile_has_garbage = tile_row0 + rows_per_tile > total_rows

        @pl.when(tile_has_garbage)
        def _masked():
            accumulate(masked=True)

        @pl.when(jnp.logical_not(tile_has_garbage))
        def _fast():
            accumulate(masked=False)
    else:
        accumulate(masked=False)


def iou_with_bce_loss(predictions, targets, alpha_bce, eps=1e-6, *,
                      rows_per_tile=4096, sub_rows=128, lanes=128,
                      num_cores=None):
    assert predictions.shape == targets.shape
    n = int(predictions.size)
    assert n > 0

    def _prep(x):
        # bf16/f16/f32 stay at native width (upcast in-kernel, halves HBM
        # traffic for narrow inputs); anything else converts to f32.
        if x.dtype not in (jnp.float32, jnp.bfloat16, jnp.float16):
            x = x.astype(jnp.float32)
        return x.reshape(-1)          # row-major flatten == torch .view(-1)

    p = _prep(predictions)
    t = _prep(targets)

    # ---- lane-misaligned tail (< 128 elements) reduced in plain JAX: no O(n)
    # host-side pad of both inputs. --------------------------------------
    n_main = (n // lanes) * lanes
    tail = n - n_main
    tail_bce = tail_int = tail_tot = jnp.float32(0.0)
    if tail:
        pt = jnp.clip(p[n_main:].astype(jnp.float32), 0.0, 1.0)
        tt = jnp.clip(t[n_main:].astype(jnp.float32), 0.0, 1.0)
        log_p = jnp.maximum(jnp.log(pt), -100.0)
        log_1mp = jnp.maximum(jnp.log(1.0 - pt), -100.0)
        tail_bce = jnp.sum(-(tt * (log_p - log_1mp) + log_1mp))
        tail_int = jnp.sum(pt * tt)
        tail_tot = jnp.sum(pt + tt)

    if n_main == 0:
        bce_sum, intersection, total = tail_bce, tail_int, tail_tot
    else:
        if tail:
            # TODO(synk): this static prefix slice may still materialize one
            # copy for lane-misaligned n; aligned shapes take the no-copy path.
            p = p[:n_main]
            t = t[:n_main]
        total_rows = n_main // lanes
        p2d = p.reshape(total_rows, lanes)
        t2d = t.reshape(total_rows, lanes)
        if total_rows < 8:
            # Tiny input (< 1024 elems): pad rows to the minimum (8,128) tile.
            # Zero rows contribute exactly 0 to every partial sum.
            pad_rows = 8 - total_rows
            p2d = jnp.pad(p2d, ((0, pad_rows), (0, 0)))
            t2d = jnp.pad(t2d, ((0, pad_rows), (0, 0)))
            total_rows = 8

        # ---- tile sizing: multiples of 8; tile must divide into sub-slabs --
        sub_rows = max(8, (sub_rows // 8) * 8)
        rows_per_tile = max(sub_rows, (rows_per_tile // sub_rows) * sub_rows)
        if rows_per_tile > total_rows:
            rows_per_tile = max(8, (total_rows // 8) * 8)
        if rows_per_tile % sub_rows:
            sub_rows = 8
        n_sub = rows_per_tile // sub_rows
        unroll = 4 if n_sub % 4 == 0 else (2 if n_sub % 2 == 0 else 1)

        # ---- grid: (cores, tiles_per_core); core axis > 1 only on 2-TC chips
        if num_cores is None:
            num_cores = _detect_num_tensorcores()
        total_tiles = pl.cdiv(total_rows, rows_per_tile)
        num_cores = max(1, min(int(num_cores), total_tiles))
        tiles_per_core = pl.cdiv(total_tiles, num_cores)
        last_block = total_tiles - 1
        covered_rows = num_cores * tiles_per_core * rows_per_tile
        need_mask = covered_rows != total_rows

        def in_map(c, i):
            # Overflow steps (uneven core split) re-read the last valid block;
            # their contribution is masked to zero inside the kernel.
            return (jnp.minimum(c * tiles_per_core + i, last_block), 0)

        kernel = functools.partial(
            _partial_sums_kernel,
            rows_per_tile=rows_per_tile, sub_rows=sub_rows, n_sub=n_sub,
            lanes=lanes, tiles_per_core=tiles_per_core, total_rows=total_rows,
            need_mask=need_mask, unroll=unroll)

        # On 2-TC chips (v7x) use CORE_PARALLEL so the leading axis is really
        # sharded across TensorCores (plain "parallel" may not change codegen).
        core_sem = (getattr(pltpu, "CORE_PARALLEL", "parallel")
                    if num_cores > 1 else "arbitrary")

        in_bytes = (p2d.size * p2d.dtype.itemsize
                    + t2d.size * t2d.dtype.itemsize)
        out_bytes = num_cores * 3 * 8 * lanes * 4
        cost = pl.CostEstimate(flops=12 * n_main, transcendentals=2 * n_main,
                               bytes_accessed=in_bytes + out_bytes)

        acc = pl.pallas_call(
            kernel,
            out_shape=jax.ShapeDtypeStruct((num_cores, 3, 8, lanes),
                                           jnp.float32),
            grid_spec=pltpu.PrefetchScalarGridSpec(
                num_scalar_prefetch=0,
                grid=(num_cores, tiles_per_core),
                in_specs=[
                    pl.BlockSpec((rows_per_tile, lanes), in_map),
                    pl.BlockSpec((rows_per_tile, lanes), in_map),
                ],
                out_specs=pl.BlockSpec((1, 3, 8, lanes),
                                       lambda c, i: (c, 0, 0, 0)),
            ),
            compiler_params=pltpu.CompilerParams(
                dimension_semantics=(core_sem, "arbitrary"),
                # 2 inputs x 2 pipeline buffers x (4096 x 128) f32 = 16 MiB;
                # lift above v5e's 16 MiB scoped default while staying well
                # inside every chip's physical VMEM (>= 64 MiB per TC).
                vmem_limit_bytes=32 * 1024 * 1024,
            ),
            cost_estimate=cost,
        )(p2d, t2d)

        # Tiny final combine in plain JAX.
        sums = jnp.sum(acc, axis=(0, 2, 3))
        bce_sum = sums[0] + tail_bce
        intersection = sums[1] + tail_int
        total = sums[2] + tail_tot

    bce = bce_sum / n / 100.0
    union = total - intersection
    iou = intersection / (union + eps)
    return 1.0 - iou + alpha_bce * bce


def _reference_loss(predictions, targets, alpha_bce, eps=1e-6):
    p = jnp.clip(predictions.reshape(-1).astype(jnp.float32), 0.0, 1.0)
    t = jnp.clip(targets.reshape(-1).astype(jnp.float32), 0.0, 1.0)
    log_p = jnp.maximum(jnp.log(p), -100.0)
    log_1mp = jnp.maximum(jnp.log(1.0 - p), -100.0)
    bce = jnp.mean(-(t * log_p + (1.0 - t) * log_1mp)) / 100.0
    intersection = jnp.sum(p * t)
    total = jnp.sum(p + t)
    union = total - intersection
    iou = intersection / (union + eps)
    return 1.0 - iou + alpha_bce * bce


if __name__ == "__main__":
    key = jax.random.PRNGKey(0)
    kp, kt = jax.random.split(key)

    # Small NCHW shapes; prediction values deliberately spill outside [0, 1]
    # to exercise the clamp.
    B, C, H, W = 2, 4, 16, 16
    predictions = jax.random.uniform(kp, (B, C, H, W), jnp.float32,
                                     minval=-0.2, maxval=1.2)
    targets = jax.random.uniform(kt, (B, C, H, W), jnp.float32,
                                 minval=0.0, maxval=1.0)
    alpha_bce = 0.5

    loss = iou_with_bce_loss(predictions, targets, alpha_bce)
    loss = jax.block_until_ready(loss)

    ref = _reference_loss(predictions, targets, alpha_bce)
    assert jnp.allclose(loss, ref, rtol=1e-5, atol=1e-5), (loss, ref)

    print("KERNEL_OK")
</pallas_src>

<mosaic_0001>
module attributes {stable_mosaic.version = 11 : i64} {
  func.func @_partial_sums_kernel(%arg0: i32, %arg1: i32, %arg2: memref<16x128xf32, #tpu.memory_space<vmem>>, %arg3: memref<16x128xf32, #tpu.memory_space<vmem>>, %arg4: memref<1x3x8x128xf32, #tpu.memory_space<vmem>>) attributes {dimension_semantics = [#tpu.dimension_semantics<arbitrary>, #tpu.dimension_semantics<arbitrary>], iteration_bounds = array<i64: 1, 1>, scalar_prefetch = 0 : i64, scratch_operands = 0 : i64, tpu.core_type = #tpu.core_type<tc>, window_params = [{transform_indices = @transform_0, window_bounds = array<i64: 16, 128>}, {transform_indices = @transform_1, window_bounds = array<i64: 16, 128>}, {transform_indices = @transform_2, window_bounds = array<i64: 1, 3, 8, 128>}]} {
    %c0_i32 = arith.constant 0 : i32
    %0 = arith.cmpi eq, %arg1, %c0_i32 : i32
    %1 = arith.extui %0 : i1 to i32
    %c0_i32_0 = arith.constant 0 : i32
    %2 = arith.cmpi ne, %1, %c0_i32_0 : i32
    scf.if %2 {
      %cst_50 = arith.constant 0.000000e+00 : f32
      %98 = vector.broadcast %cst_50 : f32 to vector<1x3x8x128xf32>
      %c0_51 = arith.constant 0 : index
      %c0_52 = arith.constant 0 : index
      %c0_53 = arith.constant 0 : index
      %c0_54 = arith.constant 0 : index
      %99 = vector.load %arg4[%c0_51, %c0_52, %c0_53, %c0_54] : memref<1x3x8x128xf32, #tpu.memory_space<vmem>>, vector<1x3x8x128xf32>
      tpu.vector_store %arg4[%c0_51, %c0_52, %c0_53, %c0_54], %98 {strides = array<i32>} : memref<1x3x8x128xf32, #tpu.memory_space<vmem>>, vector<1x3x8x128xf32>,
    } else {
    }
    %cst = arith.constant 0.000000e+00 : f32
    %3 = vector.broadcast %cst : f32 to vector<8x128xf32>
    %c0_i32_1 = arith.constant 0 : i32
    %c8_i32 = arith.constant 8 : i32
    %4 = arith.muli %c0_i32_1, %c8_i32 : i32
    %5 = tpu.assume_multiple %4, 8 : i32
    %6 = arith.index_cast %5 : i32 to index
    %c0 = arith.constant 0 : index
    %7 = vector.load %arg2[%6, %c0] : memref<16x128xf32, #tpu.memory_space<vmem>>, vector<8x128xf32>
    %8 = arith.index_cast %5 : i32 to index
    %c0_2 = arith.constant 0 : index
    %9 = vector.load %arg3[%8, %c0_2] : memref<16x128xf32, #tpu.memory_space<vmem>>, vector<8x128xf32>
    %cst_3 = arith.constant 0.000000e+00 : f32
    %cst_4 = arith.constant 1.000000e+00 : f32
    %10 = vector.broadcast %cst_3 : f32 to vector<8x128xf32>
    %11 = arith.maximumf %10, %7 : vector<8x128xf32>
    %12 = vector.broadcast %cst_4 : f32 to vector<8x128xf32>
    %13 = arith.minimumf %12, %11 : vector<8x128xf32>
    %cst_5 = arith.constant 0.000000e+00 : f32
    %cst_6 = arith.constant 1.000000e+00 : f32
    %14 = vector.broadcast %cst_5 : f32 to vector<8x128xf32>
    %15 = arith.maximumf %14, %9 : vector<8x128xf32>
    %16 = vector.broadcast %cst_6 : f32 to vector<8x128xf32>
    %17 = arith.minimumf %16, %15 : vector<8x128xf32>
    %18 = math.log %13 : vector<8x128xf32>
    %cst_7 = arith.constant -1.000000e+02 : f32
    %19 = vector.broadcast %cst_7 : f32 to vector<8x128xf32>
    %20 = arith.maximumf %18, %19 : vector<8x128xf32>
    %cst_8 = arith.constant 1.000000e+00 : f32
    %21 = vector.broadcast %cst_8 : f32 to vector<8x128xf32>
    %22 = arith.subf %21, %13 : vector<8x128xf32>
    %23 = math.log %22 : vector<8x128xf32>
    %cst_9 = arith.constant -1.000000e+02 : f32
    %24 = vector.broadcast %cst_9 : f32 to vector<8x128xf32>
    %25 = arith.maximumf %23, %24 : vector<8x128xf32>
    %26 = arith.subf %20, %25 : vector<8x128xf32>
    %27 = arith.mulf %17, %26 : vector<8x128xf32>
    %28 = arith.addf %27, %25 : vector<8x128xf32>
    %cst_10 = arith.constant 0.000000e+00 : f32
    %29 = vector.broadcast %cst_10 : f32 to vector<8x128xf32>
    %30 = arith.subf %29, %28 : vector<8x128xf32>
    %31 = arith.mulf %13, %17 : vector<8x128xf32>
    %32 = arith.addf %13, %17 : vector<8x128xf32>
    %33 = vector.shape_cast %30 : vector<8x128xf32> to vector<1x8x128xf32>
    %cst_11 = arith.constant dense<0.000000e+00> : vector<8x128xf32>
    %34 = vector.multi_reduction <add>, %33, %cst_11 [0] : vector<1x8x128xf32> to vector<8x128xf32>
    %35 = arith.addf %3, %34 : vector<8x128xf32>
    %36 = vector.shape_cast %31 : vector<8x128xf32> to vector<1x8x128xf32>
    %cst_12 = arith.constant dense<0.000000e+00> : vector<8x128xf32>
    %37 = vector.multi_reduction <add>, %36, %cst_12 [0] : vector<1x8x128xf32> to vector<8x128xf32>
    %38 = arith.addf %3, %37 : vector<8x128xf32>
    %39 = vector.shape_cast %32 : vector<8x128xf32> to vector<1x8x128xf32>
    %cst_13 = arith.constant dense<0.000000e+00> : vector<8x128xf32>
    %40 = vector.multi_reduction <add>, %39, %cst_13 [0] : vector<1x8x128xf32> to vector<8x128xf32>
    %41 = arith.addf %3, %40 : vector<8x128xf32>
    %c1_i32 = arith.constant 1 : i32
    %c8_i32_14 = arith.constant 8 : i32
    %42 = arith.muli %c1_i32, %c8_i32_14 : i32
    %43 = tpu.assume_multiple %42, 8 : i32
    %44 = arith.index_cast %43 : i32 to index
    %c0_15 = arith.constant 0 : index
    %45 = vector.load %arg2[%44, %c0_15] : memref<16x128xf32, #tpu.memory_space<vmem>>, vector<8x128xf32>
    %46 = arith.index_cast %43 : i32 to index
    %c0_16 = arith.constant 0 : index
    %47 = vector.load %arg3[%46, %c0_16] : memref<16x128xf32, #tpu.memory_space<vmem>>, vector<8x128xf32>
    %cst_17 = arith.constant 0.000000e+00 : f32
    %cst_18 = arith.constant 1.000000e+00 : f32
    %48 = vector.broadcast %cst_17 : f32 to vector<8x128xf32>
    %49 = arith.maximumf %48, %45 : vector<8x128xf32>
    %50 = vector.broadcast %cst_18 : f32 to vector<8x128xf32>
    %51 = arith.minimumf %50, %49 : vector<8x128xf32>
    %cst_19 = arith.constant 0.000000e+00 : f32
    %cst_20 = arith.constant 1.000000e+00 : f32
    %52 = vector.broadcast %cst_19 : f32 to vector<8x128xf32>
    %53 = arith.maximumf %52, %47 : vector<8x128xf32>
    %54 = vector.broadcast %cst_20 : f32 to vector<8x128xf32>
    %55 = arith.minimumf %54, %53 : vector<8x128xf32>
    %56 = math.log %51 : vector<8x128xf32>
    %cst_21 = arith.constant -1.000000e+02 : f32
    %57 = vector.broadcast %cst_21 : f32 to vector<8x128xf32>
    %58 = arith.maximumf %56, %57 : vector<8x128xf32>
    %cst_22 = arith.constant 1.000000e+00 : f32
    %59 = vector.broadcast %cst_22 : f32 to vector<8x128xf32>
    %60 = arith.subf %59, %51 : vector<8x128xf32>
    %61 = math.log %60 : vector<8x128xf32>
    %cst_23 = arith.constant -1.000000e+02 : f32
    %62 = vector.broadcast %cst_23 : f32 to vector<8x128xf32>
    %63 = arith.maximumf %61, %62 : vector<8x128xf32>
    %64 = arith.subf %58, %63 : vector<8x128xf32>
    %65 = arith.mulf %55, %64 : vector<8x128xf32>
    %66 = arith.addf %65, %63 : vector<8x128xf32>
    %cst_24 = arith.constant 0.000000e+00 : f32
    %67 = vector.broadcast %cst_24 : f32 to vector<8x128xf32>
    %68 = arith.subf %67, %66 : vector<8x128xf32>
    %69 = arith.mulf %51, %55 : vector<8x128xf32>
    %70 = arith.addf %51, %55 : vector<8x128xf32>
    %71 = vector.shape_cast %68 : vector<8x128xf32> to vector<1x8x128xf32>
    %cst_25 = arith.constant dense<0.000000e+00> : vector<8x128xf32>
    %72 = vector.multi_reduction <add>, %71, %cst_25 [0] : vector<1x8x128xf32> to vector<8x128xf32>
    %73 = arith.addf %35, %72 : vector<8x128xf32>
    %74 = vector.shape_cast %69 : vector<8x128xf32> to vector<1x8x128xf32>
    %cst_26 = arith.constant dense<0.000000e+00> : vector<8x128xf32>
    %75 = vector.multi_reduction <add>, %74, %cst_26 [0] : vector<1x8x128xf32> to vector<8x128xf32>
    %76 = arith.addf %38, %75 : vector<8x128xf32>
    %77 = vector.shape_cast %70 : vector<8x128xf32> to vector<1x8x128xf32>
    %cst_27 = arith.constant dense<0.000000e+00> : vector<8x128xf32>
    %78 = vector.multi_reduction <add>, %77, %cst_27 [0] : vector<1x8x128xf32> to vector<8x128xf32>
    %79 = arith.addf %41, %78 : vector<8x128xf32>
    %c2_i32 = arith.constant 2 : i32
    %c0_28 = arith.constant 0 : index
    %c0_29 = arith.constant 0 : index
    %c0_30 = arith.constant 0 : index
    %c0_31 = arith.constant 0 : index
    %80 = vector.load %arg4[%c0_28, %c0_29, %c0_30, %c0_31] : memref<1x3x8x128xf32, #tpu.memory_space<vmem>>, vector<1x1x8x128xf32>
    %81 = vector.shape_cast %80 : vector<1x1x8x128xf32> to vector<8x128xf32>
    %82 = arith.addf %81, %73 : vector<8x128xf32>
    %c0_32 = arith.constant 0 : index
    %c0_33 = arith.constant 0 : index
    %c0_34 = arith.constant 0 : index
    %c0_35 = arith.constant 0 : index
    %83 = vector.load %arg4[%c0_32, %c0_33, %c0_34, %c0_35] : memref<1x3x8x128xf32, #tpu.memory_space<vmem>>, vector<1x1x8x128xf32>
    %84 = vector.shape_cast %83 : vector<1x1x8x128xf32> to vector<8x128xf32>
    %85 = vector.shape_cast %82 : vector<8x128xf32> to vector<1x1x8x128xf32>
    tpu.vector_store %arg4[%c0_32, %c0_33, %c0_34, %c0_35], %85 {strides = array<i32>} : memref<1x3x8x128xf32, #tpu.memory_space<vmem>>, vector<1x1x8x128xf32>,
    %c0_36 = arith.constant 0 : index
    %c1 = arith.constant 1 : index
    %c0_37 = arith.constant 0 : index
    %c0_38 = arith.constant 0 : index
    %86 = vector.load %arg4[%c0_36, %c1, %c0_37, %c0_38] : memref<1x3x8x128xf32, #tpu.memory_space<vmem>>, vector<1x1x8x128xf32>
    %87 = vector.shape_cast %86 : vector<1x1x8x128xf32> to vector<8x128xf32>
    %88 = arith.addf %87, %76 : vector<8x128xf32>
    %c0_39 = arith.constant 0 : index
    %c1_40 = arith.constant 1 : index
    %c0_41 = arith.constant 0 : index
    %c0_42 = arith.constant 0 : index
    %89 = vector.load %arg4[%c0_39, %c1_40, %c0_41, %c0_42] : memref<1x3x8x128xf32, #tpu.memory_space<vmem>>, vector<1x1x8x128xf32>
    %90 = vector.shape_cast %89 : vector<1x1x8x128xf32> to vector<8x128xf32>
    %91 = vector.shape_cast %88 : vector<8x128xf32> to vector<1x1x8x128xf32>
    tpu.vector_store %arg4[%c0_39, %c1_40, %c0_41, %c0_42], %91 {strides = array<i32>} : memref<1x3x8x128xf32, #tpu.memory_space<vmem>>, vector<1x1x8x128xf32>,
    %c0_43 = arith.constant 0 : index
    %c2 = arith.constant 2 : index
    %c0_44 = arith.constant 0 : index
    %c0_45 = arith.constant 0 : index
    %92 = vector.load %arg4[%c0_43, %c2, %c0_44, %c0_45] : memref<1x3x8x128xf32, #tpu.memory_space<vmem>>, vector<1x1x8x128xf32>
    %93 = vector.shape_cast %92 : vector<1x1x8x128xf32> to vector<8x128xf32>
    %94 = arith.addf %93, %79 : vector<8x128xf32>
    %c0_46 = arith.constant 0 : index
    %c2_47 = arith.constant 2 : index
    %c0_48 = arith.constant 0 : index
    %c0_49 = arith.constant 0 : index
    %95 = vector.load %arg4[%c0_46, %c2_47, %c0_48, %c0_49] : memref<1x3x8x128xf32, #tpu.memory_space<vmem>>, vector<1x1x8x128xf32>
    %96 = vector.shape_cast %95 : vector<1x1x8x128xf32> to vector<8x128xf32>
    %97 = vector.shape_cast %94 : vector<8x128xf32> to vector<1x1x8x128xf32>
    tpu.vector_store %arg4[%c0_46, %c2_47, %c0_48, %c0_49], %97 {strides = array<i32>} : memref<1x3x8x128xf32, #tpu.memory_space<vmem>>, vector<1x1x8x128xf32>,
    return
  }
  func.func @transform_0(%arg0: i32, %arg1: i32) -> (i32, i32) {
    %c1_i32 = arith.constant 1 : i32
    %0 = arith.muli %arg0, %c1_i32 : i32
    %1 = arith.addi %0, %arg1 : i32
    %c0_i32 = arith.constant 0 : i32
    %2 = arith.minsi %1, %c0_i32 : i32
    %c0_i32_0 = arith.constant 0 : i32
    %c0_i32_1 = arith.constant 0 : i32
    return %2, %c0_i32_0 : i32, i32
  }
  func.func @transform_1(%arg0: i32, %arg1: i32) -> (i32, i32) {
    %c1_i32 = arith.constant 1 : i32
    %0 = arith.muli %arg0, %c1_i32 : i32
    %1 = arith.addi %0, %arg1 : i32
    %c0_i32 = arith.constant 0 : i32
    %2 = arith.minsi %1, %c0_i32 : i32
    %c0_i32_0 = arith.constant 0 : i32
    %c0_i32_1 = arith.constant 0 : i32
    return %2, %c0_i32_0 : i32, i32
  }
  func.func @transform_2(%arg0: i32, %arg1: i32) -> (i32, i32, i32, i32) {
    %c0_i32 = arith.constant 0 : i32
    %c0_i32_0 = arith.constant 0 : i32
    %c0_i32_1 = arith.constant 0 : i32
    %c0_i32_2 = arith.constant 0 : i32
    return %arg0, %c0_i32, %c0_i32_0, %c0_i32_1 : i32, i32, i32, i32
  }
}

</mosaic_0001>

<bundles_post_ra>
// kernel: tpu_custom_call.1
= control target key start
LH: loop header
LB: loop body
LE: loop exit
PB: predicated region body
PF: predicated region fallthrough
CT: control target
= control target key end

     0   :  { %7 = vsyncpa [#allocation3], 0  ;;  %s288_s0 = inlined_call_operand.hbm [shape: f32[16,128], index: 0, kind: input, shape index: {}]   ;;  %s289_s1 = inlined_call_operand.hbm [shape: f32[16,128], index: 1, kind: input, shape index: {}]   ;;  %s290_s2 = inlined_call_operand.hbm [shape: f32[1,3,8,128], index: 2, kind: output, shape index: {}]  }
   0x1   :  { %8 = vsyncpa [#allocation6], 0 }
   0x2   :  { %9 = vsyncpa [#allocation4], 0  ;;  %s20_s11 = sshll.u32 %s288_s0, 4  ;;  %s250_s12 = smov [#allocation2]   ;;  %s21_s11 = int_to_ptr.hbm [resolvable:$true] %s20_s11 }
   0x3   :  { %s22_s13 = sshll.u32 %s250_s12, 4  ;;  %s39_s16 = sshll.u32 %s289_s1, 4  ;;  %s23_s13 = int_to_ptr.vmem [resolvable:$true] %s22_s13  ;;  %s40_s16 = int_to_ptr.hbm [resolvable:$true] %s39_s16 }
   0x4   :  { %s251_s17 = smov 128   ;;  %s252_s18 = smov 8  }
   0x5   :  { %28 = dma.hbm_to_vmem [thread:$0]  %s21_s11, 256, %s23_s13, [#allocation3], %s251_s17, %s251_s17, %s252_s18  }
   0x6   :  { %s253_s19 = smov [#allocation5]  }
   0x7   :  { %s41_s20 = sshll.u32 %s253_s19, 4  ;;  %s42_s20 = int_to_ptr.vmem [resolvable:$true] %s41_s20 }
   0x8   :  { %47 = dma.hbm_to_vmem [thread:$0]  %s40_s16, 256, %s42_s20, [#allocation6], %s251_s17, %s251_s17, %s252_s18  }
   0x9   :  { %244 = dma.done.wait [#allocation3], 256  }
   0xa   :  { %245 = vsyncadd [#allocation3], 4294967040 }
   0xb   :  { %246 = dma.done.wait [#allocation6], 256  }
   0xc   :  { %247 = vsyncadd [#allocation6], 4294967040  ;;  %v71_v0 = vld [vmem:[#allocation2] sm:$0xff]  ;;  %v72_v1 = vld [vmem:[#allocation5] sm:$0xff]  ;;  %s254_s0 = smov [#allocation7]   ;;  %s140_s23 = sshll.u32 %s290_s2, 4  ;;  %s141_s23 = int_to_ptr.hbm [resolvable:$true] %s140_s23 }
   0xd   :  { %v97_v2 = vld [vmem:[#allocation2 + $0x8] sm:$0xff]  ;;  %v73_v3 = vmax.f32 %v71_v0, 0.0  ;;  %v75_v4 = vmax.f32 %v72_v1, 0.0  ;;  %v99_v5 = vld [vmem:[#allocation5 + $0x8] sm:$0xff]  ;;  %s138_s1 = sshll.u32 %s254_s0, 4  ;;  %s139_s1 = int_to_ptr.vmem [resolvable:$true] %s138_s1 }
   0xe   :  { %v100_v6 = vmax.f32 %v97_v2, 0.0  ;;  %v102_v7 = vmax.f32 %v99_v5, 0.0 }
   0xf   :  { %v74_v8 = vmin.f32 %v73_v3, 1.0  ;;  %v76_v9 = vmin.f32 %v75_v4, 1.0 }
  0x10   :  { %v101_v10 = vmin.f32 %v100_v6, 1.0  ;;  %v103_v11 = vmin.f32 %v102_v7, 1.0 }
  0x11   :  { %164 = vlog2.f32 %v74_v8  ;;  %v80_v12 = vsub.f32 1.0, %v74_v8  ;;  %v88_v14 = vmul.f32 %v76_v9, %v74_v8  ;;  %v89_v16 = vadd.f32 %v76_v9, %v74_v8 }
  0x12   :  { %v107_v13 = vsub.f32 1.0, %v101_v10  ;;  %166 = vlog2.f32 %v101_v10  ;;  %v115_v15 = vmul.f32 %v103_v11, %v101_v10  ;;  %v116_v17 = vadd.f32 %v103_v11, %v101_v10 }
  0x13   :  { %168 = vlog2.f32 %v80_v12 }
  0x14   :  { %170 = vlog2.f32 %v107_v13  ;;  %v120_v18 = vadd.f32 %v115_v15, %v88_v14  ;;  %v122_v19 = vadd.f32 %v116_v17, %v89_v16 }
  0x16   :  { %129 = vst [vmem:[#allocation7 + $0x8] sm:$0xff] %v120_v18 }
  0x17   :  { %v165_v20 = vpop.eup %164  ;;  %133 = vst [vmem:[#allocation7 + $0x10] sm:$0xff] %v122_v19 }
  0x18   :  { %v167_v21 = vpop.eup %166  ;;  %v78_v22 = vmul.f32 0.6931472, %v165_v20 }
  0x19   :  { %v169_v23 = vpop.eup %168  ;;  %v105_v24 = vmul.f32 0.6931472, %v167_v21 }
  0x1a   :  { %v171_v25 = vpop.eup %170  ;;  %v79_v26 = vmax.f32 %v78_v22, -100.0  ;;  %v82_v27 = vmul.f32 0.6931472, %v169_v23 }
  0x1b   :  { %v106_v28 = vmax.f32 %v105_v24, -100.0  ;;  %v109_v29 = vmul.f32 0.6931472, %v171_v25 }
  0x1c   :  { %v83_v30 = vmax.f32 %v82_v27, -100.0 }
  0x1d   :  { %v110_v31 = vmax.f32 %v109_v29, -100.0 }
  0x1e   :  { %v84_v32 = vsub.f32 %v79_v26, %v83_v30 }
  0x1f   :  { %v111_v33 = vsub.f32 %v106_v28, %v110_v31 }
  0x20   :  { %v85_v34 = vmul.f32 %v84_v32, %v76_v9 }
  0x21   :  { %v112_v35 = vmul.f32 %v111_v33, %v103_v11 }
  0x22   :  { %v86_v36 = vadd.f32 %v85_v34, %v83_v30 }
  0x23   :  { %v113_v37 = vadd.f32 %v112_v35, %v110_v31 }
  0x24   :  { %v87_v38 = vsub.f32 0.0, %v86_v36 }
  0x25   :  { %v114_v39 = vsub.f32 0.0, %v113_v37 }
  0x27   :  { %v118_v40 = vadd.f32 %v114_v39, %v87_v38 }
  0x29   :  { %125 = vst [vmem:[#allocation7] sm:$0xff] %v118_v40 }
  0x2a   :  { %146 = dma.vmem_to_hbm [thread:$0]  %s139_s1, 384, %s141_s23, [#allocation4], %s251_s17, %s251_s17, %s252_s18  }
  0x2b   :  { %248 = dma.done.wait [#allocation4], 384  }
  0x2c   :  { %249 = vsyncadd [#allocation4], 4294966912 }
  0x2d   :  { %151 = vsyncpa [#allocation3], 1 }
  0x2e   :  { %152 = vsyncpa [#allocation6], 1 }
  0x2f   :  { %153 = vsyncpa [#allocation4], 1 }

</bundles_post_ra>
